<compile_context>
chip_gen: v6e
topology: v6e:2x2x1
jax: 0.10.0
libtpu: 0.0.40
codegen_flags: <defaults>
</compile_context>

<pallas_src>
import functools

import jax
import jax.numpy as jnp
from jax.experimental import pallas as pl
from jax.experimental.pallas import tpu as pltpu


# Candidate lane (last-dim) widths for the lane-dense slab, widest first.
_LANE_CANDIDATES = (8192, 4096, 2048, 1024, 512, 256, 128)


def _act_q_kernel(scal_ref, x_ref, o_ref, *, lo, hi):
    """Elementwise quantize one (block_rows, lanes) tile.

    scal_ref: SMEM scalar-prefetch array [alpha, 1/alpha] (f32).
    """
    alpha = scal_ref[0]
    inv_alpha = scal_ref[1]
    x = x_ref[...].astype(jnp.float32)
    q = jnp.clip(jnp.round(x * inv_alpha), lo, hi) * alpha
    o_ref[...] = q.astype(o_ref.dtype)


def _quantize_alpha(alpha, alpha_bit):
    """Scalar alpha quantization (matches ACT_Q.forward, alpha_bit != 32)."""
    q_code = alpha_bit - jnp.ceil(jnp.log2(jnp.max(alpha)) + 1 - 1e-05)
    return (
        jnp.clip(
            jnp.round(alpha * 2.0 ** q_code),
            -(2.0 ** (alpha_bit - 1)),
            2.0 ** (alpha_bit - 1) - 1,
        )
        / 2.0 ** q_code
    )


def act_q_forward(
    x,
    alpha,
    *,
    bit=4,
    signed=False,
    alpha_bit=32,
    block_elems=512 * 1024,     # ~2 MiB f32 tile; in+out double-buffered ~8 MiB VMEM
    min_pallas_elems=1 << 17,   # below ~512 KiB f32, a fused XLA elementwise op wins
):
    """Pallas implementation of ACT_Q.forward (eval / post-init behavior)."""
    if bit == 32:
        return x

    pwr_coef = 2 ** (bit - 1)
    lo = -float(pwr_coef) if signed else 0.0
    hi = float(pwr_coef - 1)

    # --- scalar glue: optional alpha quantization (plain JAX scalar math) ---
    alpha = jnp.reshape(alpha.astype(jnp.float32), ())
    if alpha_bit != 32:
        alpha = _quantize_alpha(alpha, alpha_bit)
    inv_alpha = 1.0 / alpha                  # hoisted out of the hot loop
    scalars = jnp.stack([alpha, inv_alpha])  # (2,) f32 -> SMEM via scalar prefetch

    orig_shape = x.shape
    orig_dtype = x.dtype
    n = x.size

    # --- pick a lane-dense slab (rows, lanes); NO pad/unpad HBM round-trip ---
    lanes = 0
    if n >= min_pallas_elems:
        for c in _LANE_CANDIDATES:
            if n % c == 0 and n // c >= 8:
                lanes = c
                break

    if lanes == 0:
        # Small or ragged (not 128-divisible) input: fused XLA elementwise path.
        out = jnp.clip(jnp.round(x.astype(jnp.float32) * inv_alpha), lo, hi) * alpha
        return out.astype(orig_dtype)

    rows = n // lanes
    rows_ceil8 = ((rows + 7) // 8) * 8
    block_rows = max(8, (block_elems // lanes) // 8 * 8)
    block_rows = min(block_rows, rows_ceil8)
    grid = (pl.cdiv(rows, block_rows),)  # last block may be partial -> Pallas masks it

    slab = x.reshape(rows, lanes)        # metadata-only reshape (row-major), no copy

    out = pl.pallas_call(
        functools.partial(_act_q_kernel, lo=lo, hi=hi),
        out_shape=jax.ShapeDtypeStruct((rows, lanes), orig_dtype),
        grid_spec=pltpu.PrefetchScalarGridSpec(
            num_scalar_prefetch=1,
            grid=grid,
            in_specs=[pl.BlockSpec((block_rows, lanes), lambda i, s: (i, 0))],
            out_specs=pl.BlockSpec((block_rows, lanes), lambda i, s: (i, 0)),
        ),
        compiler_params=pltpu.CompilerParams(
            dimension_semantics=("parallel",),
        ),
    )(scalars, slab)

    return out.reshape(orig_shape)


def act_q_reference(x, alpha, *, bit=4, signed=False, alpha_bit=32):
    """Pure-JAX reference mirroring the PyTorch forward."""
    if bit == 32:
        return x
    pwr_coef = 2 ** (bit - 1)
    alpha = alpha.astype(jnp.float32)
    if alpha_bit != 32:
        alpha = _quantize_alpha(alpha, alpha_bit)
    lo = -pwr_coef if signed else 0
    hi = pwr_coef - 1
    return jnp.clip(jnp.round(x / alpha), lo, hi) * alpha


if __name__ == "__main__":
    key = jax.random.PRNGKey(0)
    k_x, k_a, k_b, k_c = jax.random.split(key, 4)

    # alpha ~ torch.rand(1): uniform [0, 1), deterministic via PRNGKey(0).
    alpha = jax.random.uniform(k_a, (1,), dtype=jnp.float32)

    # ---- 1) Small NCHW conv activation (module-scale demo): fused XLA fast path.
    x_small = jax.random.normal(k_x, (2, 4, 16, 16), dtype=jnp.float32)
    out_small = jax.block_until_ready(
        act_q_forward(x_small, alpha, bit=4, signed=True, alpha_bit=32)
    )
    ref_small = act_q_reference(x_small, alpha, bit=4, signed=True, alpha_bit=32)
    assert out_small.shape == x_small.shape and out_small.dtype == x_small.dtype
    assert jnp.max(jnp.abs(out_small - ref_small)) < 1e-5

    # ---- 2) Same small tensor but forced through the Pallas kernel.
    out_small_k = jax.block_until_ready(
        act_q_forward(
            x_small, alpha, bit=4, signed=True, alpha_bit=32, min_pallas_elems=0
        )
    )
    assert jnp.max(jnp.abs(out_small_k - ref_small)) < 1e-5

    # ---- 3) Larger activation -> Pallas path by default; also exercises alpha_bit != 32.
    x_big = jax.random.normal(k_b, (8, 32, 32, 32), dtype=jnp.float32)
    out_big = jax.block_until_ready(
        act_q_forward(x_big, alpha, bit=4, signed=False, alpha_bit=8)
    )
    ref_big = act_q_reference(x_big, alpha, bit=4, signed=False, alpha_bit=8)
    assert out_big.shape == x_big.shape
    assert jnp.max(jnp.abs(out_big - ref_big)) < 1e-5

    # ---- 4) Shape whose row count is not a multiple of the block rows
    #         (partial last block handled by Pallas masking).
    x_ragged = jax.random.normal(k_c, (100, 64, 128), dtype=jnp.float32)
    out_rag = jax.block_until_ready(
        act_q_forward(x_ragged, alpha, bit=4, signed=True, alpha_bit=32)
    )
    ref_rag = act_q_reference(x_ragged, alpha, bit=4, signed=True, alpha_bit=32)
    assert out_rag.shape == x_ragged.shape
    assert jnp.max(jnp.abs(out_rag - ref_rag)) < 1e-5

    # ---- 5) bit == 32 path: identity.
    assert jnp.array_equal(act_q_forward(x_small, alpha, bit=32), x_small)

    print("KERNEL_OK")
</pallas_src>

<mosaic_0001>
module attributes {stable_mosaic.version = 11 : i64} {
  func.func @_act_q_kernel(%arg0: i32, %arg1: memref<2xf32, #tpu.memory_space<smem>>, %arg2: memref<8x256xf32, #tpu.memory_space<vmem>>, %arg3: memref<8x256xf32, #tpu.memory_space<vmem>>) attributes {dimension_semantics = [#tpu.dimension_semantics<parallel>], iteration_bounds = array<i64: 1>, scalar_prefetch = 1 : i64, scratch_operands = 0 : i64, tpu.core_type = #tpu.core_type<tc>, window_params = [{transform_indices = @transform_0, window_bounds = array<i64: 8, 256>}, {transform_indices = @transform_1, window_bounds = array<i64: 8, 256>}]} {
    %c0 = arith.constant 0 : index
    %0 = memref.load %arg1[%c0] : memref<2xf32, #tpu.memory_space<smem>>
    %c1 = arith.constant 1 : index
    %1 = memref.load %arg1[%c1] : memref<2xf32, #tpu.memory_space<smem>>
    %c0_0 = arith.constant 0 : index
    %c0_1 = arith.constant 0 : index
    %2 = vector.load %arg2[%c0_0, %c0_1] : memref<8x256xf32, #tpu.memory_space<vmem>>, vector<8x256xf32>
    %3 = vector.broadcast %1 : f32 to vector<8x256xf32>
    %4 = arith.mulf %2, %3 : vector<8x256xf32>
    %5 = math.roundeven %4 : vector<8x256xf32>
    %cst = arith.constant -8.000000e+00 : f32
    %cst_2 = arith.constant 7.000000e+00 : f32
    %6 = vector.broadcast %cst : f32 to vector<8x256xf32>
    %7 = arith.maximumf %6, %5 : vector<8x256xf32>
    %8 = vector.broadcast %cst_2 : f32 to vector<8x256xf32>
    %9 = arith.minimumf %8, %7 : vector<8x256xf32>
    %10 = vector.broadcast %0 : f32 to vector<8x256xf32>
    %11 = arith.mulf %9, %10 : vector<8x256xf32>
    %c0_3 = arith.constant 0 : index
    %c0_4 = arith.constant 0 : index
    %12 = vector.load %arg3[%c0_3, %c0_4] : memref<8x256xf32, #tpu.memory_space<vmem>>, vector<8x256xf32>
    tpu.vector_store %arg3[%c0_3, %c0_4], %11 {strides = array<i32>} : memref<8x256xf32, #tpu.memory_space<vmem>>, vector<8x256xf32>,
    return
  }
  func.func @transform_0(%arg0: i32, %arg1: memref<2xf32, #tpu.memory_space<smem>>) -> (i32, i32) {
    %c0_i32 = arith.constant 0 : i32
    %c0_i32_0 = arith.constant 0 : i32
    return %arg0, %c0_i32 : i32, i32
  }
  func.func @transform_1(%arg0: i32, %arg1: memref<2xf32, #tpu.memory_space<smem>>) -> (i32, i32) {
    %c0_i32 = arith.constant 0 : i32
    %c0_i32_0 = arith.constant 0 : i32
    return %arg0, %c0_i32 : i32, i32
  }
}

</mosaic_0001>

<bundles_post_ra>
// kernel: tpu_custom_call.1
= control target key start
LH: loop header
LB: loop body
LE: loop exit
PB: predicated region body
PF: predicated region fallthrough
CT: control target
= control target key end

     0   :  { %s133_s9 = smov [#allocation3]   ;;  %s160_s0 = inlined_call_operand.hbm [shape: f32[2], index: 0, kind: input, shape index: {}]   ;;  %s161_s1 = inlined_call_operand.hbm [shape: f32[8,256], index: 1, kind: input, shape index: {}]   ;;  %s162_s2 = inlined_call_operand.hbm [shape: f32[8,256], index: 2, kind: output, shape index: {}]  }
   0x1   :  { %8 = dma.hbm_to_smem %s160_s0, 16, %s133_s9, [#allocation2] }
   0x2   :  { %127 = dma.done.wait [#allocation2], 16 }
   0x3   :  { %128 = vsyncadd [#allocation2], 4294967280 }
   0x4   :  { %10 = sfence }
   0x5   :  { %11 = vsyncpa [#allocation5], 0 }
   0x6   :  { %12 = vsyncpa [#allocation6], 0  ;;  %s134_s12 = smov [#allocation4]  }
   0x7   :  { %s19_s13 = sshll.u32 %s134_s12, 4  ;;  %s20_s13 = int_to_ptr.vmem [resolvable:$true] %s19_s13 }
   0x8   :  { %s95_s14 = scalar_lea.vmem %s20_s13, 256  ;;  %p100_p1 = scmp.lt.s32.totalorder %s20_s13, %s20_s13 }
   0x9   :  { %p96_p0 = scmp.ne.s32.totalorder %s20_s13, %s95_s14  ;;  %p101_p2 = scmp.lt.s32.totalorder %s95_s14, %s95_s14 }
   0xb   :  { %p102_p3 = por %p101_p2, %p100_p1 }
   0xd   :  { %p103_p4 = pnand %p102_p3, %p96_p0 }
   0xf   :  { %106 = shalt.err (!%p103_p4)
}
  0x10   :  { %22 = dma.hbm_to_vmem [thread:$0]  %s161_s1, 256, %s20_s13, [#allocation5]  }
  0x11   :  { %129 = dma.done.wait [#allocation5], 256  }
  0x12   :  { %130 = vsyncadd [#allocation5], 4294967040  ;;  %s59_s0 = sld [smem:[#allocation3 + $0x1]]  ;;  %v28_v0 = vld [vmem:[#allocation4] sm:$0xff]  ;;  %v29_v2 = vld [vmem:[#allocation4 + $0x8] sm:$0xff]  ;;  %s135_s1 = smov [#allocation7]  }
  0x13   :  { %s26_s17 = sld [smem:[#allocation3]]  ;;  %s50_s18 = sshll.u32 %s135_s1, 4  ;;  %s51_s18 = int_to_ptr.vmem [resolvable:$true] %s50_s18 }
  0x14   :  { %s107_s19 = scalar_lea.vmem %s51_s18, 256  ;;  %p112_p6 = scmp.lt.s32.totalorder %s51_s18, %s51_s18 }
  0x15   :  { %p108_p5 = scmp.ne.s32.totalorder %s51_s18, %s107_s19  ;;  %p113_p7 = scmp.lt.s32.totalorder %s107_s19, %s107_s19 }
  0x17   :  { %p114_p8 = por %p113_p7, %p112_p6 }
  0x18   :  { %v30_v1 = vstv %s59_s0 }
  0x19   :  { %v31_v3 = vmul.f32 %v30_v1, %v28_v0  ;;  %v32_v4 = vmul.f32 %v30_v1, %v29_v2  ;;  %v39_v20 = vstv %s26_s17  ;;  %p115_p9 = pnand %p114_p8, %p108_p5 }
  0x1b   :  { %v62_v5 = vcvt.f32.s32 %v31_v3  ;;  %v60_v6 = vand.u32 2147483647, %v31_v3  ;;  %v70_v7 = vcvt.f32.s32 %v32_v4  ;;  %v65_v9 = vand.u32 2147483648, %v31_v3 }
  0x1c   :  { %v68_v10 = vand.u32 2147483647, %v32_v4  ;;  %v73_v12 = vand.u32 2147483648, %v32_v4 }
  0x1d   :  { %v63_v8 = vcvt.s32.f32 %v62_v5  ;;  %v71_v11 = vcvt.s32.f32 %v70_v7  ;;  %vm61_vm0 = vcmp.lt.f32.partialorder %v60_v6, 8388608.0 }
  0x1e   :  { %vm69_vm1 = vcmp.lt.f32.partialorder %v68_v10, 8388608.0 }
  0x1f   :  { %v64_v13 = vand.u32 2147483647, %v63_v8  ;;  %v72_v14 = vand.u32 2147483647, %v71_v11 }
  0x21   :  { %v66_v15 = vor.u32 %v65_v9, %v64_v13  ;;  %v74_v16 = vor.u32 %v73_v12, %v72_v14 }
  0x23   :  { %v67_v17 = vsel %vm61_vm0, %v66_v15, %v31_v3  ;;  %v75_v19 = vsel %vm69_vm1, %v74_v16, %v32_v4 }
  0x24   :  { %v35_v18 = vmax.f32 %v67_v17, -8.0  ;;  %v36_v21 = vmax.f32 %v75_v19, -8.0 }
  0x26   :  { %v37_v22 = vmin.f32 %v35_v18, 7.0  ;;  %v38_v23 = vmin.f32 %v36_v21, 7.0 }
  0x28   :  { %v40_v24 = vmul.f32 %v39_v20, %v37_v22  ;;  %v41_v25 = vmul.f32 %v39_v20, %v38_v23 }
  0x2a   :  { %42 = vst [vmem:[#allocation7] sm:$0xff] %v40_v24  ;;  %43 = vst [vmem:[#allocation7 + $0x8] sm:$0xff] %v41_v25 }
  0x2b   :  { %118 = shalt.err (!%p115_p9)
}
  0x2c   :  { %53 = dma.vmem_to_hbm [thread:$0]  %s51_s18, 256, %s162_s2, [#allocation6]  }
  0x2d   :  { %131 = dma.done.wait [#allocation6], 256  }
  0x2e   :  { %132 = vsyncadd [#allocation6], 4294967040 }
  0x2f   :  { %57 = vsyncpa [#allocation5], 1 }
  0x30   :  { %58 = vsyncpa [#allocation6], 1 }

</bundles_post_ra>
